<compile_context>
chip_gen: v6e
topology: v6e:2x2x1
jax: 0.10.0
libtpu: 0.0.40
codegen_flags: <defaults>
</compile_context>

<pallas_src>
import functools

import jax
import jax.numpy as jnp
import numpy as np
from jax import lax
from jax.experimental import pallas as pl
from jax.experimental.pallas import tpu as pltpu

_MASK_VALUE = -1e30


@functools.lru_cache(maxsize=1)
def _vmem_limit():
    """64 MiB scoped VMEM on 128-MiB parts (v5e/v6e), 32 MiB on v7x (64 MiB)."""
    try:
        cap = getattr(pltpu.get_tpu_info(), "vmem_capacity_bytes", 0)
    except Exception:  # pragma: no cover - defensive
        cap = 0
    return (64 if cap >= 100 * 1024 * 1024 else 32) * 1024 * 1024


def _fit_tile(dim, desired, align):
    """Largest tile <= desired that divides `dim` and is a multiple of `align`.
    Falls back to the full dim (always legal for a BlockSpec)."""
    if dim <= desired:
        return dim
    t = (desired // align) * align
    while t >= align:
        if dim % t == 0:
            return t
        t -= align
    return dim


# ----------------------------- Linear kernels -------------------------------

def _matmul_bias_kernel(x_ref, w_ref, b_ref, o_ref, acc_ref):
    # x: (tm, tk) bf16, w: (tk, tn) bf16 (pre-transposed), b: (1, tn) f32.
    @pl.when(pl.program_id(2) == 0)
    def _init():
        acc_ref[...] = jnp.zeros_like(acc_ref)

    acc_ref[...] += jnp.dot(x_ref[...], w_ref[...],
                            preferred_element_type=jnp.float32)

    @pl.when(pl.program_id(2) == pl.num_programs(2) - 1)
    def _fin():
        o_ref[...] = (acc_ref[...] + b_ref[...]).astype(o_ref.dtype)


def _matmul_kernel(x_ref, w_ref, o_ref, acc_ref):
    @pl.when(pl.program_id(2) == 0)
    def _init():
        acc_ref[...] = jnp.zeros_like(acc_ref)

    acc_ref[...] += jnp.dot(x_ref[...], w_ref[...],
                            preferred_element_type=jnp.float32)

    @pl.when(pl.program_id(2) == pl.num_programs(2) - 1)
    def _fin():
        o_ref[...] = acc_ref[...].astype(o_ref.dtype)


def pallas_linear(x, w_t, b=None, *, out_dtype=jnp.float32,
                  tm=512, tn=512, tk=512):
    """y = x @ w_t (+ b).  x: (M, K) bf16, w_t: (K, N) bf16, b: (N,) f32."""
    M, K = x.shape
    K2, N = w_t.shape
    assert K == K2
    tm = _fit_tile(M, tm, 8)
    tn = _fit_tile(N, tn, 128)
    tk = _fit_tile(K, tk, 128)
    grid = (M // tm, N // tn, K // tk)

    in_specs = [
        pl.BlockSpec((tm, tk), lambda i, j, k: (i, k)),
        pl.BlockSpec((tk, tn), lambda i, j, k: (k, j)),
    ]
    if b is not None:
        in_specs.append(pl.BlockSpec((1, tn), lambda i, j, k: (0, j)))
        kernel = _matmul_bias_kernel
        args = (x, w_t, b.reshape(1, N).astype(jnp.float32))
    else:
        kernel = _matmul_kernel
        args = (x, w_t)

    return pl.pallas_call(
        kernel,
        out_shape=jax.ShapeDtypeStruct((M, N), out_dtype),
        grid=grid,
        in_specs=in_specs,
        out_specs=pl.BlockSpec((tm, tn), lambda i, j, k: (i, j)),
        scratch_shapes=[pltpu.VMEM((tm, tn), jnp.float32)],
        compiler_params=pltpu.CompilerParams(
            dimension_semantics=("parallel", "parallel", "arbitrary"),
            vmem_limit_bytes=_vmem_limit(),
        ),
    )(*args)


# --------------------------- Flash GQA attention -----------------------------

def _flash_gqa_kernel(q_ref, k_ref, v_ref, o_ref, m_sc, l_sc, acc_sc, q2_sc,
                      *, tq, tk, G, D):
    # q_ref: (tq, G*D) bf16 — the whole GQA group of query heads for one KV head.
    # k_ref / v_ref: (tk, D) bf16.  o_ref: (tq, G*D).
    # Row layout of the flattened problem is head-major: row = g*tq + t.
    qi = pl.program_id(2)
    ki = pl.program_id(3)

    @pl.when(ki == 0)
    def _init():
        m_sc[...] = jnp.full_like(m_sc, _MASK_VALUE)
        l_sc[...] = jnp.zeros_like(l_sc)
        acc_sc[...] = jnp.zeros_like(acc_sc)
        # Unpack the q tile into (G*tq, D) once per q tile (not per kv step).
        for g in range(G):
            q2_sc[g * tq:(g + 1) * tq, :] = q_ref[:, g * D:(g + 1) * D]

    def _step(apply_mask):
        q2 = q2_sc[...]                                   # (G*tq, D) bf16
        k = k_ref[...]                                    # (tk, D)   bf16
        # Contract on D for both operands (A @ B^T on the MXU).
        s = lax.dot_general(q2, k, (((1,), (1,)), ((), ())),
                            preferred_element_type=jnp.float32)  # (G*tq, tk)
        if apply_mask:
            rows = qi * tq + lax.broadcasted_iota(jnp.int32, (tq, tk), 0)
            cols = ki * tk + lax.broadcasted_iota(jnp.int32, (tq, tk), 1)
            mask = cols <= rows                           # (tq, tk)
            s = jnp.where(mask[None], s.reshape(G, tq, tk), _MASK_VALUE)
            s = s.reshape(G * tq, tk)
        m_prev = m_sc[...]
        m_new = jnp.maximum(m_prev, jnp.max(s, axis=-1, keepdims=True))
        alpha = jnp.exp(m_prev - m_new)
        p = jnp.exp(s - m_new)                            # f32
        l_sc[...] = alpha * l_sc[...] + jnp.sum(p, axis=-1, keepdims=True)
        acc_sc[...] = alpha * acc_sc[...] + jnp.dot(
            p.astype(jnp.bfloat16), v_ref[...],
            preferred_element_type=jnp.float32)
        m_sc[...] = m_new

    visited = ki * tk < (qi + 1) * tq                     # not fully above diag
    below = (ki + 1) * tk <= qi * tq                      # fully below diag
    crossing = jnp.logical_and(visited, jnp.logical_not(below))

    @pl.when(below)
    def _unmasked():
        _step(False)

    @pl.when(crossing)
    def _masked():
        _step(True)

    @pl.when(ki == pl.num_programs(3) - 1)
    def _fin():
        inv_l = pl.reciprocal(l_sc[...], approx=True)     # deferred normalization
        out = (acc_sc[...] * inv_l).astype(o_ref.dtype)   # (G*tq, D)
        for g in range(G):
            o_ref[:, g * D:(g + 1) * D] = out[g * tq:(g + 1) * tq, :]


def pallas_flash_gqa_fused(qkv, *, B, S, Hkv, G, D, out_dtype=jnp.bfloat16,
                           tq=256, tk=256):
    """Causal GQA attention reading q/k/v straight from the fused, token-major
    QKV activation `qkv` of shape (B*S, (H + 2*Hkv) * D) and writing a
    token-major (B*S, H*D) output."""
    if D % 128 != 0:
        raise NotImplementedError(
            "pallas_flash_gqa_fused requires head_dim % 128 == 0 for "
            "lane-dense K/V/O column blocks")
    H = Hkv * G
    tq = _fit_tile(S, tq, 8)
    tk = _fit_tile(S, tk, 8)
    n_q = S // tq
    n_k = S // tk
    grid = (B, Hkv, n_q, n_k)

    def q_map(b, h, qi, ki):
        return (b * n_q + qi, h)

    def kv_map(col_block):
        def m(b, h, qi, ki):
            # Clamp to the causal frontier: skipped (fully-masked) kv tiles
            # repeat the previous block index so Pallas elides the DMA.
            kc = jnp.minimum(ki, ((qi + 1) * tq - 1) // tk)
            return (b * n_k + kc, col_block + h)
        return m

    kernel = functools.partial(_flash_gqa_kernel, tq=tq, tk=tk, G=G, D=D)

    return pl.pallas_call(
        kernel,
        out_shape=jax.ShapeDtypeStruct((B * S, H * D), out_dtype),
        grid=grid,
        in_specs=[
            pl.BlockSpec((tq, G * D), q_map),         # q columns [0, H*D)
            pl.BlockSpec((tk, D), kv_map(H)),          # k columns [H*D, (H+Hkv)*D)
            pl.BlockSpec((tk, D), kv_map(H + Hkv)),    # v columns
        ],
        out_specs=pl.BlockSpec((tq, G * D), q_map),
        scratch_shapes=[
            pltpu.VMEM((G * tq, 1), jnp.float32),      # m
            pltpu.VMEM((G * tq, 1), jnp.float32),      # l
            pltpu.VMEM((G * tq, D), jnp.float32),      # acc
            pltpu.VMEM((G * tq, D), jnp.bfloat16),     # flattened q cache
        ],
        compiler_params=pltpu.CompilerParams(
            dimension_semantics=("parallel", "parallel", "parallel", "arbitrary"),
            vmem_limit_bytes=_vmem_limit(),
        ),
    )(qkv, qkv, qkv)


# ------------------------------ Forward pass ---------------------------------

def buding_attention_forward(x, params, *, num_heads, num_kv_heads, head_dim):
    B, S, hidden = x.shape
    H, Hkv, D = num_heads, num_kv_heads, head_dim
    G = H // Hkv
    scaling = D ** (-0.5)

    # Pre-transposed (K, N) bf16 weights (lane-dense, no in-kernel .T), fused
    # QKV GEMM, and the softmax scaling folded into the Q weights/bias.
    w_qkv_t = jnp.concatenate(
        [params["wq"] * scaling, params["wk"], params["wv"]], axis=0
    ).T.astype(jnp.bfloat16)
    b_qkv = jnp.concatenate(
        [params["bq"] * scaling, params["bk"], params["bv"]]).astype(jnp.float32)
    wo_t = params["wo"].T.astype(jnp.bfloat16)

    x2 = x.reshape(B * S, hidden).astype(jnp.bfloat16)

    # Single fused QKV projection, bf16 activations out.
    qkv = pallas_linear(x2, w_qkv_t, b_qkv, out_dtype=jnp.bfloat16)

    # Flash GQA attention directly on the fused token-major buffer (no XLA
    # transposes in or out); output is token-major (B*S, H*D) bf16.
    o = pallas_flash_gqa_fused(qkv, B=B, S=S, Hkv=Hkv, G=G, D=D)

    out = pallas_linear(o, wo_t, None, out_dtype=jnp.float32)  # o_proj, no bias
    return out.reshape(B, S, hidden)


# --------------------------- Pure-JAX reference ------------------------------

def reference_forward(x, params, *, num_heads, num_kv_heads, head_dim):
    B, S, hidden = x.shape
    scaling = head_dim ** (-0.5)
    groups = num_heads // num_kv_heads

    q = x @ params["wq"].T + params["bq"]
    k = x @ params["wk"].T + params["bk"]
    v = x @ params["wv"].T + params["bv"]

    q = q.reshape(B, S, num_heads, head_dim).transpose(0, 2, 1, 3)
    k = k.reshape(B, S, num_kv_heads, head_dim).transpose(0, 2, 1, 3)
    v = v.reshape(B, S, num_kv_heads, head_dim).transpose(0, 2, 1, 3)

    k = jnp.repeat(k, groups, axis=1)
    v = jnp.repeat(v, groups, axis=1)

    s = jnp.einsum("bhqd,bhkd->bhqk", q, k) * scaling
    causal = jnp.tril(jnp.ones((S, S), dtype=bool))
    s = jnp.where(causal[None, None], s, jnp.finfo(jnp.float32).min)
    p = jax.nn.softmax(s, axis=-1)
    o = jnp.einsum("bhqk,bhkd->bhqd", p, v)
    o = o.transpose(0, 2, 1, 3).reshape(B, S, num_heads * head_dim)
    return o @ params["wo"].T


# ---------------------------------- Main -------------------------------------

if __name__ == "__main__":
    # Small config consistent with the module: head_dim = hidden // num_heads.
    # head_dim is kept at 128 so every block (q: G*D, k/v: D, out: G*D columns)
    # is lane-dense.
    B, S = 2, 8
    num_heads, num_kv_heads = 4, 2
    head_dim = 128
    hidden = num_heads * head_dim  # 512

    key = jax.random.PRNGKey(0)
    ks = jax.random.split(key, 8)
    scale = 0.02
    params = {
        "wq": scale * jax.random.normal(ks[0], (num_heads * head_dim, hidden), jnp.float32),
        "bq": scale * jax.random.normal(ks[1], (num_heads * head_dim,), jnp.float32),
        "wk": scale * jax.random.normal(ks[2], (num_kv_heads * head_dim, hidden), jnp.float32),
        "bk": scale * jax.random.normal(ks[3], (num_kv_heads * head_dim,), jnp.float32),
        "wv": scale * jax.random.normal(ks[4], (num_kv_heads * head_dim, hidden), jnp.float32),
        "bv": scale * jax.random.normal(ks[5], (num_kv_heads * head_dim,), jnp.float32),
        "wo": scale * jax.random.normal(ks[6], (hidden, num_heads * head_dim), jnp.float32),
    }
    x = jax.random.normal(ks[7], (B, S, hidden), jnp.float32)

    out = buding_attention_forward(
        x, params, num_heads=num_heads, num_kv_heads=num_kv_heads, head_dim=head_dim
    )
    out = jax.block_until_ready(out)

    ref = reference_forward(
        x, params, num_heads=num_heads, num_kv_heads=num_kv_heads, head_dim=head_dim
    )
    # bf16 activations + bf16 MXU operands (f32 accumulation) + approx
    # reciprocal -> loosened tolerance vs. the f32 reference.
    np.testing.assert_allclose(np.asarray(out), np.asarray(ref), rtol=2e-2, atol=1e-2)
    assert out.shape == (B, S, hidden) and out.dtype == jnp.float32

    print("KERNEL_OK")
</pallas_src>

<mosaic_0001>
module attributes {stable_mosaic.version = 11 : i64} {
  func.func @_matmul_bias_kernel(%arg0: i32, %arg1: i32, %arg2: i32, %arg3: memref<16x512xbf16, #tpu.memory_space<vmem>>, %arg4: memref<512x512xbf16, #tpu.memory_space<vmem>>, %arg5: memref<1x512xf32, #tpu.memory_space<vmem>>, %arg6: memref<16x512xbf16, #tpu.memory_space<vmem>>, %arg7: memref<16x512xf32, #tpu.memory_space<vmem>>) attributes {dimension_semantics = [#tpu.dimension_semantics<parallel>, #tpu.dimension_semantics<parallel>, #tpu.dimension_semantics<arbitrary>], iteration_bounds = array<i64: 1, 2, 1>, scalar_prefetch = 0 : i64, scratch_operands = 1 : i64, tpu.core_type = #tpu.core_type<tc>, window_params = [{transform_indices = @transform_0, window_bounds = array<i64: 16, 512>}, {transform_indices = @transform_1, window_bounds = array<i64: 512, 512>}, {transform_indices = @transform_2, window_bounds = array<i64: 1, 512>}, {transform_indices = @transform_3, window_bounds = array<i64: 16, 512>}]} {
    %c0_i32 = arith.constant 0 : i32
    %0 = arith.cmpi eq, %arg2, %c0_i32 : i32
    %1 = arith.extui %0 : i1 to i32
    %c0_i32_0 = arith.constant 0 : i32
    %2 = arith.cmpi ne, %1, %c0_i32_0 : i32
    scf.if %2 {
      %cst_10 = arith.constant 0.000000e+00 : f32
      %12 = vector.broadcast %cst_10 : f32 to vector<16x512xf32>
      %c0_11 = arith.constant 0 : index
      %c0_12 = arith.constant 0 : index
      %13 = vector.load %arg7[%c0_11, %c0_12] : memref<16x512xf32, #tpu.memory_space<vmem>>, vector<16x512xf32>
      tpu.vector_store %arg7[%c0_11, %c0_12], %12 {strides = array<i32>} : memref<16x512xf32, #tpu.memory_space<vmem>>, vector<16x512xf32>,
    } else {
    }
    %c0 = arith.constant 0 : index
    %c0_1 = arith.constant 0 : index
    %3 = vector.load %arg7[%c0, %c0_1] : memref<16x512xf32, #tpu.memory_space<vmem>>, vector<16x512xf32>
    %c0_2 = arith.constant 0 : index
    %c0_3 = arith.constant 0 : index
    %4 = vector.load %arg3[%c0_2, %c0_3] : memref<16x512xbf16, #tpu.memory_space<vmem>>, vector<16x512xbf16>
    %c0_4 = arith.constant 0 : index
    %c0_5 = arith.constant 0 : index
    %5 = vector.load %arg4[%c0_4, %c0_5] : memref<512x512xbf16, #tpu.memory_space<vmem>>, vector<512x512xbf16>
    %cst = arith.constant dense<0.000000e+00> : vector<16x512xf32>
    %6 = tpu.matmul %4, %5, %cst {dimension_numbers = #tpu.dot_dimension_numbers<[1], [0], [0], [1], [0, 0, 1, 1], [], []>} : vector<16x512xbf16>, vector<512x512xbf16>, vector<16x512xf32> -> vector<16x512xf32>
    %7 = arith.addf %3, %6 : vector<16x512xf32>
    %c0_6 = arith.constant 0 : index
    %c0_7 = arith.constant 0 : index
    %8 = vector.load %arg7[%c0_6, %c0_7] : memref<16x512xf32, #tpu.memory_space<vmem>>, vector<16x512xf32>
    tpu.vector_store %arg7[%c0_6, %c0_7], %7 {strides = array<i32>} : memref<16x512xf32, #tpu.memory_space<vmem>>, vector<16x512xf32>,
    %c0_i32_8 = arith.constant 0 : i32
    %9 = arith.cmpi eq, %arg2, %c0_i32_8 : i32
    %10 = arith.extui %9 : i1 to i32
    %c0_i32_9 = arith.constant 0 : i32
    %11 = arith.cmpi ne, %10, %c0_i32_9 : i32
    scf.if %11 {
      %c0_10 = arith.constant 0 : index
      %c0_11 = arith.constant 0 : index
      %12 = vector.load %arg7[%c0_10, %c0_11] : memref<16x512xf32, #tpu.memory_space<vmem>>, vector<16x512xf32>
      %c0_12 = arith.constant 0 : index
      %c0_13 = arith.constant 0 : index
      %13 = vector.load %arg5[%c0_12, %c0_13] : memref<1x512xf32, #tpu.memory_space<vmem>>, vector<1x512xf32>
      %14 = vector.broadcast %13 : vector<1x512xf32> to vector<16x512xf32>
      %15 = arith.addf %12, %14 : vector<16x512xf32>
      %16 = arith.truncf %15 : vector<16x512xf32> to vector<16x512xbf16>
      %c0_14 = arith.constant 0 : index
      %c0_15 = arith.constant 0 : index
      %17 = vector.load %arg6[%c0_14, %c0_15] : memref<16x512xbf16, #tpu.memory_space<vmem>>, vector<16x512xbf16>
      tpu.vector_store %arg6[%c0_14, %c0_15], %16 {strides = array<i32>} : memref<16x512xbf16, #tpu.memory_space<vmem>>, vector<16x512xbf16>,
    } else {
    }
    return
  }
  func.func @transform_0(%arg0: i32, %arg1: i32, %arg2: i32) -> (i32, i32) {
    %c0_i32 = arith.constant 0 : i32
    return %arg0, %arg2 : i32, i32
  }
  func.func @transform_1(%arg0: i32, %arg1: i32, %arg2: i32) -> (i32, i32) {
    %c0_i32 = arith.constant 0 : i32
    return %arg2, %arg1 : i32, i32
  }
  func.func @transform_2(%arg0: i32, %arg1: i32, %arg2: i32) -> (i32, i32) {
    %c0_i32 = arith.constant 0 : i32
    %c0_i32_0 = arith.constant 0 : i32
    return %c0_i32, %arg1 : i32, i32
  }
  func.func @transform_3(%arg0: i32, %arg1: i32, %arg2: i32) -> (i32, i32) {
    %c0_i32 = arith.constant 0 : i32
    return %arg0, %arg1 : i32, i32
  }
}

</mosaic_0001>

<bundles_post_ra>
// kernel: tpu_custom_call.1
= control target key start
LH: loop header
LB: loop body
LE: loop exit
PB: predicated region body
PF: predicated region fallthrough
CT: control target
= control target key end

     0   :  { %s2496_s0 = inlined_call_operand.hbm [shape: bf16[16,512], index: 0, kind: input, shape index: {}]   ;;  %s2497_s1 = inlined_call_operand.hbm [shape: bf16[512,1024], index: 1, kind: input, shape index: {}]   ;;  %s2498_s2 = inlined_call_operand.hbm [shape: f32[1,1024], index: 2, kind: input, shape index: {}]   ;;  %s2499_s3 = inlined_call_operand.hbm [shape: bf16[16,1024], index: 3, kind: output, shape index: {}]  }
   0x1   :  { %2505 = sst [smem:[#allocation13_spill]] %s2497_s1 }
   0x2   :  { %8 = vsyncpa [#allocation4], 0 }
   0x3   :  { %9 = vsyncpa [#allocation7], 0 }
   0x4   :  { %11 = vsyncpa [#allocation7 + $0x1], 0 }
   0x5   :  { %12 = vsyncpa [#allocation5], 0 }
   0x6   :  { %14 = vsyncpa [#allocation5 + $0x1], 0  ;;  %s2142_s12 = smov 0   ;;  %s2144_s13 = smov 0  }
   0x7   :  { %s2146_s14 = smov 0   ;;  %s2148_s15 = smov 0  }
   0x8   :  { %s2150_s16 = smov 0   ;;  %s2152_s17 = smov 0  }
   0x9 LB: > { %s35_s18 = sadd.s32 1, %s2106_s16  ;;  %s76_s19 = sadd.s32 1, %s2098_s14  ;;  %s2110_s17 = sphi %s2152_s17, %s20_s17   ;;  %s2106_s16 = sphi %s2150_s16, %s2526_s16   ;;  %s2102_s15 = sphi %s2148_s15, %s2525_s15   ;;  %s2098_s14 = sphi %s2146_s14, %s2524_s14   ;;  %s2094_s13 = sphi %s2144_s13, %s2523_s13   ;;  %s2090_s12 = sphi %s2142_s12, %s2522_s12  }
   0xa   : > { %p37_p0 = scmp.ge.s32.totalorder %s35_s18, 2  ;;  %p83_p1 = scmp.ne.s32.totalorder %s2098_s14, %s2094_s13 }
   0xb   : > { %p84_p2 = scmp.eq.s32.totalorder %s2110_s17, 0  ;;  %p1688_p6 = scmp.lt.s32.totalorder %s2110_s17, 2 }
   0xc   : > { %s2528_s18 = smov (%p37_p0, %s35_s18), 0  ;;  %s186_s22 = sand.u32 1, %s2110_s17  }
   0xd   : > { %p2182_p3 = por %p84_p2, %p83_p1  ;;  %s72_s21 = ssub.s32 %s2106_s16, %s2528_s18 }
   0xe   : > { %p74_p5 = scmp.eq.s32.totalorder %s72_s21, 0  ;;  %s188_s23 = sand.u32 1, %s2098_s14  }
   0xf   : > { %s1503_s25 = sshll.u32 %s188_s23, 10  ;;  %s1655_s26 = sshll.u32 %s2106_s16, 8 }
  0x10   : > { %s2193_s24 = scalar_select %p74_p5, %s2098_s14, %s76_s19  }
  0x11   : > { %s2507_s1 = sld [smem:[#allocation13_spill]]  ;;  %s190_s30 = scalar_lea.vmem [#allocation6], %s1503_s25 }
  0x12   : > { %s200_s4 = sshll.u32 %s190_s30, 4  ;;  %p2203_p7 = pnand %p1688_p6, %p2182_p3  ;;  %s201_s4 = int_to_ptr.vmem [resolvable:$true] %s200_s4 }
  0x13   : > { %s2207_s6 = scalar_lea.sflag [#allocation7], %s186_s22  ;;  %s1957_s7 = scalar_lea.vmem %s201_s4, 16384 }
  0x14   : > { %p1946_p8 = pneg %p2203_p7  ;;  %p1958_p9 = scmp.ne.s32.totalorder %s201_s4, %s1957_s7 }
  0x15   : > { %s2112_s8 = smov [#allocation6]  }
  0x16   : > { %p1960_p10 = pnand %p1958_p9, %p1946_p8  ;;  %s1962_s9 = sshll.u32 %s2112_s8, 4  ;;  %s1963_s9 = int_to_ptr.vmem [resolvable:$false] %s1962_s9 }
  0x17   : > { %s199_s29 = scalar_lea.hbm %s2507_s1, %s1655_s26  ;;  %s1964_s10 = scalar_lea.vmem %s1963_s9, 32768 }
  0x18   : > { %p1961_p11 = pneg %p1960_p10  ;;  %p1965_p12 = scmp.lt.s32.totalorder %s201_s4, %s1963_s9 }
  0x19   : > { %p1966_p13 = scmp.lt.s32.totalorder %s1964_s10, %s1957_s7 }
  0x1b   : > { %p1967_p0 = por %p1966_p13, %p1965_p12 }
  0x1d   : > { %p1968_p2 = pnand %p1967_p0, %p1961_p11 }
  0x1f   : > { %1971 = shalt.err (!%p1968_p2)
}
  0x20   : > { %s2113_s11 = smov 512   ;;  %s2500_s19 = smov 256  }
  0x21   : > { %s2501_s20 = smov 16   ;;  %s2220_s21 = sadd.s32 4294967295, %s2110_s17  }
  0x22   : > { %1679 = dma.hbm_to_vmem [thread:$0]  (!%p2203_p7), %s199_s29, 16384, %s201_s4, %s2207_s6, %s2113_s11, %s2500_s19, %s2501_s20  }
  0x23   : > { %s1499_s22 = sadd.s32 4294967294, %s2110_s17   ;;  %p89_p3 = scmp.ne.s32.totalorder %s2094_s13, %s2090_s12 }
  0x24   : > { %p2503_p5 = scmp.eq.s32.totalorder %s2220_s21, 0  ;;  %p141_p6 = scmp.eq.s32.totalorder %s2220_s21, 1 }
  0x25   : > { %p147_p9 = scmp.eq.s32.totalorder %s1499_s22, 1  ;;  %p1500_p11 = scmp.ge.s32.totalorder %s2110_s17, 1 }
  0x26   : > { %p2229_p10 = por %p2503_p5, %p89_p3  ;;  %p2237_p12 = por %p141_p6, %p83_p1 }
  0x27   : > { %p2241_p13 = por %p147_p9, %p89_p3  ;;  %p154_p0 = scmp.lt.s32.totalorder %s2110_s17, 3 }
  0x28   : > { %s2509_s25 = scalar_select %p2229_p10, 1, 0 }
  0x29   : > { %s2510_s26 = scalar_select %p2237_p12, 1, 0 }
  0x2a   : > { %s2511_s27 = scalar_select %p2241_p13, 1, 0 }
  0x2b   : > { %s1506_s28 = sshll.u32 %s188_s23, 2  ;;  %p2248_p2 = pnand %p1500_p11, %p154_p0 }
  0x2c   : > { %s2116_s30 = smov [#allocation3]   ;;  %s1656_s7 = sshll.u32 %s2106_s16, 6 }
  0x2d   : > { %s172_s4 = sshll.u32 %s2116_s30, 4  ;;  %p1672_p1 = pneg %p2248_p2  ;;  %s2252_s4 = int_to_ptr.vmem [resolvable:$true] %s172_s4 }
  0x2e   : > { %s220_s10 = scalar_lea.hbm %s2498_s2, %s1656_s7  ;;  %s214_s11 = scalar_lea.vmem [#allocation8], %s1506_s28 }
  0x2f   : > { %s222_s22 = sshll.u32 %s214_s11, 4  ;;  %p2262_p3 = pnand %p1672_p1, %p2503_p5  ;;  %s223_s22 = int_to_ptr.vmem [resolvable:$true] %s222_s22 }
  0x30   : > { %s1985_s19 = scalar_lea.vmem %s223_s22, 64  ;;  %s2117_s30 = smov [#allocation8]  }
  0x31   : > { %p1986_p6 = scmp.ne.s32.totalorder %s223_s22, %s1985_s19  ;;  %s1990_s20 = sshll.u32 %s2117_s30, 4  ;;  %s1991_s20 = int_to_ptr.vmem [resolvable:$false] %s1990_s20 }
  0x32   : > { %s1992_s1 = scalar_lea.vmem %s1991_s20, 128  ;;  %p1993_p0 = scmp.lt.s32.totalorder %s223_s22, %s1991_s20 }
  0x33   : > { %p1988_p9 = pnand %p1986_p6, %p1946_p8  ;;  %p1994_p4 = scmp.lt.s32.totalorder %s1992_s1, %s1985_s19 }
  0x35   : > { %p1989_p11 = pneg %p1988_p9  ;;  %p1995_p13 = por %p1994_p4, %p1993_p0 }
  0x37   : > { %p1996_p12 = pnand %p1995_p13, %p1989_p11 }
  0x39   : > { %1999 = shalt.err (!%p1996_p12)
}
  0x3a   : > { %1682 = dma.hbm_to_vmem [thread:$0]  (!%p2203_p7), %s220_s10, 64, %s223_s22, %s2207_s6  }
  0x3b   : > { %p2002_p8 = pneg %p2262_p3  ;;  %s2011_s28 = scalar_lea.vmem %s2252_s4, 512 }
  0x3c   : > { %p2012_p1 = scmp.ne.s32.totalorder %s2252_s4, %s2011_s28  ;;  %p2019_p5 = scmp.lt.s32.totalorder %s2252_s4, %s2252_s4 }
  0x3d   : > { %p2020_p10 = scmp.lt.s32.totalorder %s2011_s28, %s2011_s28 }
  0x3e   : > { %p2014_p6 = pnand %p2012_p1, %p2002_p8 }
  0x3f   : > { %p2021_p4 = por %p2020_p10, %p2019_p5 }
  0x40   : > { %p2015_p9 = pneg %p2014_p6 }
  0x42   : > { %p2022_p13 = pnand %p2021_p4, %p2015_p9 }
  0x44   : > { %2025 = shalt.err (!%p2022_p13)
}
  0x45   : > { %s2514_s1 = smov 16   ;;  %s2515_s5 = smov 256  }
  0x46   : > { %1675 = dma.hbm_to_vmem [thread:$0]  (!%p2262_p3), %s2496_s0, 512, %s2252_s4, [#allocation4], %s2515_s5, %s2515_s5, %s2514_s1  }
  0x47   : > { %231 = sbr.rel (%p2248_p2) target bundleno = 432 (0x1b0), region = 32  ;;  %p2516_p7 = scmp.eq.s32.totalorder (!%p2248_p2), %s2220_s21, 0 }
  0x4c   : > { %2077 = dma.done.wait (%p2516_p7), [#allocation4], 512   ;;  %p2517_p5 = pmov %p2516_p7 }
  0x4d   : > { %s237_s20 = sand.u32 1, %s2220_s21   ;;  %s2295_s7 = sand.u32 1, %s2094_s13  }
  0x4e   : > { %2079 = vsyncadd (%p2517_p5), [#allocation4], 4294966784  ;;  %s1511_s8 = sshll.u32 %s2295_s7, 10  ;;  %s238_s9 = scalar_lea.sflag [#allocation7], %s237_s20 }
  0x4f   : > { %s2298_s10 = scalar_lea.vmem [#allocation6], %s1511_s8  ;;  %p2518_p10 = scmp.ne.s32.totalorder %s2509_s25, 0 }
  0x51   : > { %2081 = dma.done.wait (%p2518_p10), %s238_s9, 16448  }
  0x52   : > { %2083 = vsyncadd (%p2518_p10), %s238_s9, 4294950848  ;;  %v1746_v0 = vld [vmem:[%s2298_s10 + $0xe4] ss:$16 sps:$4 sm:$0xff]   ;;  %v1750_v2 = vld [vmem:[%s2298_s10 + $0xe0] ss:$16 sps:$4 sm:$0xff]   ;;  %s1512_s21 = sshll.u32 %s2295_s7, 2 }
  0x53   : > { %v1748_v1 = vld [vmem:[%s2298_s10 + $0x2e4] ss:$16 sps:$4 sm:$0xff]   ;;  %1097 = vmatprep.subr.bf16.mxu0 %v1746_v0  ;;  %v1751_v3 = vld [vmem:[%s2298_s10 + $0x2e0] ss:$16 sps:$4 sm:$0xff]   ;;  %v1847_v51 = vld [vmem:[#allocation3 + $0xc] ss:$16 sps:$4 sm:$0xff]  }
  0x54   : > { %1140 = vmatprep.subr.bf16.mxu1 %v1748_v1  ;;  %v1752_v4 = vld [vmem:[%s2298_s10 + $0xc4] ss:$16 sps:$4 sm:$0xff]   ;;  %1098 = vmatpush1.bf16.msra.mxu0 %v1750_v2  ;;  %v1756_v6 = vld [vmem:[%s2298_s10 + $0xc0] ss:$16 sps:$4 sm:$0xff]   ;;  %v1850_v2 = vld [vmem:[%s2298_s10 + $0xec] ss:$16 sps:$4 sm:$0xff]  }
  0x55   : > { %1141 = vmatpush1.bf16.msra.mxu1 %v1751_v3  ;;  %v1754_v5 = vld [vmem:[%s2298_s10 + $0x2c4] ss:$16 sps:$4 sm:$0xff]   ;;  %1099 = vmatprep.subr.bf16.mxu0 %v1752_v4  ;;  %v1757_v7 = vld [vmem:[%s2298_s10 + $0x2c0] ss:$16 sps:$4 sm:$0xff]   ;;  %v1853_v3 = vld [vmem:[%s2298_s10 + $0x2ec] ss:$16 sps:$4 sm:$0xff]  }
  0x56   : > { %1142 = vmatprep.subr.bf16.mxu1 %v1754_v5  ;;  %v1758_v8 = vld [vmem:[%s2298_s10 + $0xa4] ss:$16 sps:$4 sm:$0xff]   ;;  %v1762_v10 = vld [vmem:[%s2298_s10 + $0xa0] ss:$16 sps:$4 sm:$0xff]   ;;  %1172 = vmatprep.mubr.bf16.mxu1 %v1847_v51  ;;  %v2372_v5 = vld [vmem:[#allocation3 + $0x8] ss:$16 sps:$4 sm:$0xff]  }
  0x57   : > { %v1760_v9 = vld [vmem:[%s2298_s10 + $0x2a4] ss:$16 sps:$4 sm:$0xff]   ;;  %v1763_v11 = vld [vmem:[%s2298_s10 + $0x2a0] ss:$16 sps:$4 sm:$0xff]   ;;  %s250_s25 = scalar_lea.vmem [#allocation8], %s1512_s21  ;;  %s1513_s29 = sshll.u32 %s2295_s7, 5 }
  0x58   : > { %1100 = vmatpush1.bf16.msra.mxu0 %v1756_v6  ;;  %v1764_v12 = vld [vmem:[%s2298_s10 + $0x84] ss:$16 sps:$4 sm:$0xff]   ;;  %v1768_v14 = vld [vmem:[%s2298_s10 + $0x80] ss:$16 sps:$4 sm:$0xff]   ;;  %v1848_v6 = vld [vmem:[%s2298_s10 + $0xe8] ss:$16 sps:$4 sm:$0xff]  }
  0x59   : > { %1143 = vmatpush1.bf16.msra.mxu1 %v1757_v7  ;;  %1101 = vmatprep.subr.bf16.mxu0 %v1758_v8  ;;  %v1766_v13 = vld [vmem:[%s2298_s10 + $0x284] ss:$16 sps:$4 sm:$0xff]   ;;  %v1769_v15 = vld [vmem:[%s2298_s10 + $0x280] ss:$16 sps:$4 sm:$0xff]   ;;  %v1851_v7 = vld [vmem:[%s2298_s10 + $0x2e8] ss:$16 sps:$4 sm:$0xff]  }
  0x5a   : > { %1144 = vmatprep.subr.bf16.mxu1 %v1760_v9  ;;  %v1770_v16 = vld [vmem:[%s2298_s10 + $0x64] ss:$16 sps:$4 sm:$0xff]   ;;  %v1774_v18 = vld [vmem:[%s2298_s10 + $0x60] ss:$16 sps:$4 sm:$0xff]   ;;  %v1856_v8 = vld [vmem:[%s2298_s10 + $0xcc] ss:$16 sps:$4 sm:$0xff]  }
  0x5b   : > { %v1772_v17 = vld [vmem:[%s2298_s10 + $0x264] ss:$16 sps:$4 sm:$0xff]   ;;  %v1775_v19 = vld [vmem:[%s2298_s10 + $0x260] ss:$16 sps:$4 sm:$0xff]   ;;  %v1859_v9 = vld [vmem:[%s2298_s10 + $0x2cc] ss:$16 sps:$4 sm:$0xff]  }
  0x5c   : > { %1102 = vmatpush1.bf16.msra.mxu0 %v1762_v10  ;;  %v1776_v20 = vld [vmem:[%s2298_s10 + $0x44] ss:$16 sps:$4 sm:$0xff]   ;;  %v1780_v22 = vld [vmem:[%s2298_s10 + $0x40] ss:$16 sps:$4 sm:$0xff]   ;;  %v1854_v10 = vld [vmem:[%s2298_s10 + $0xc8] ss:$16 sps:$4 sm:$0xff]  }
  0x5d   : > { %1145 = vmatpush1.bf16.msra.mxu1 %v1763_v11  ;;  %1103 = vmatprep.subr.bf16.mxu0 %v1764_v12  ;;  %v1778_v21 = vld [vmem:[%s2298_s10 + $0x244] ss:$16 sps:$4 sm:$0xff]   ;;  %v1781_v23 = vld [vmem:[%s2298_s10 + $0x240] ss:$16 sps:$4 sm:$0xff]   ;;  %v1857_v11 = vld [vmem:[%s2298_s10 + $0x2c8] ss:$16 sps:$4 sm:$0xff]  }
  0x5e   : > { %1146 = vmatprep.subr.bf16.mxu1 %v1766_v13  ;;  %v1782_v24 = vld [vmem:[%s2298_s10 + $0x24] ss:$16 sps:$4 sm:$0xff]   ;;  %v1786_v26 = vld [vmem:[%s2298_s10 + $0x20] ss:$16 sps:$4 sm:$0xff]   ;;  %v1862_v12 = vld [vmem:[%s2298_s10 + $0xac] ss:$16 sps:$4 sm:$0xff]  }
  0x5f   : > { %v1784_v25 = vld [vmem:[%s2298_s10 + $0x224] ss:$16 sps:$4 sm:$0xff]   ;;  %v1787_v27 = vld [vmem:[%s2298_s10 + $0x220] ss:$16 sps:$4 sm:$0xff]   ;;  %v1865_v13 = vld [vmem:[%s2298_s10 + $0x2ac] ss:$16 sps:$4 sm:$0xff]  }
  0x60   : > { %1104 = vmatpush1.bf16.msra.mxu0 %v1768_v14  ;;  %v1788_v28 = vld [vmem:[%s2298_s10 + $0x4] ss:$16 sps:$4 sm:$0xff]   ;;  %v1792_v30 = vld [vmem:[%s2298_s10] ss:$16 sps:$4 sm:$0xff]   ;;  %v1860_v14 = vld [vmem:[%s2298_s10 + $0xa8] ss:$16 sps:$4 sm:$0xff]  }
  0x61   : > { %1147 = vmatpush1.bf16.msra.mxu1 %v1769_v15  ;;  %1105 = vmatprep.subr.bf16.mxu0 %v1770_v16  ;;  %v1790_v29 = vld [vmem:[%s2298_s10 + $0x204] ss:$16 sps:$4 sm:$0xff]   ;;  %v1793_v31 = vld [vmem:[%s2298_s10 + $0x200] ss:$16 sps:$4 sm:$0xff]   ;;  %v1863_v15 = vld [vmem:[%s2298_s10 + $0x2a8] ss:$16 sps:$4 sm:$0xff]  }
  0x62   : > { %1148 = vmatprep.subr.bf16.mxu1 %v1772_v17  ;;  %v1794_v32 = vld [vmem:[%s2298_s10 + $0x1e4] ss:$16 sps:$4 sm:$0xff]   ;;  %v1798_v34 = vld [vmem:[%s2298_s10 + $0x1e0] ss:$16 sps:$4 sm:$0xff]   ;;  %v1868_v16 = vld [vmem:[%s2298_s10 + $0x8c] ss:$16 sps:$4 sm:$0xff]  }
  0x63   : > { %v1796_v33 = vld [vmem:[%s2298_s10 + $0x3e4] ss:$16 sps:$4 sm:$0xff]   ;;  %v1799_v35 = vld [vmem:[%s2298_s10 + $0x3e0] ss:$16 sps:$4 sm:$0xff]   ;;  %v1871_v17 = vld [vmem:[%s2298_s10 + $0x28c] ss:$16 sps:$4 sm:$0xff]  }
  0x64   : > { %1106 = vmatpush1.bf16.msra.mxu0 %v1774_v18  ;;  %v1800_v36 = vld [vmem:[%s2298_s10 + $0x1c4] ss:$16 sps:$4 sm:$0xff]   ;;  %v1804_v38 = vld [vmem:[%s2298_s10 + $0x1c0] ss:$16 sps:$4 sm:$0xff]   ;;  %v1866_v18 = vld [vmem:[%s2298_s10 + $0x88] ss:$16 sps:$4 sm:$0xff]  }
  0x65   : > { %1149 = vmatpush1.bf16.msra.mxu1 %v1775_v19  ;;  %1107 = vmatprep.subr.bf16.mxu0 %v1776_v20  ;;  %v1802_v37 = vld [vmem:[%s2298_s10 + $0x3c4] ss:$16 sps:$4 sm:$0xff]   ;;  %v1805_v39 = vld [vmem:[%s2298_s10 + $0x3c0] ss:$16 sps:$4 sm:$0xff]   ;;  %v1869_v19 = vld [vmem:[%s2298_s10 + $0x288] ss:$16 sps:$4 sm:$0xff]  }
  0x66   : > { %1150 = vmatprep.subr.bf16.mxu1 %v1778_v21  ;;  %v1806_v40 = vld [vmem:[%s2298_s10 + $0x1a4] ss:$16 sps:$4 sm:$0xff]   ;;  %v1810_v42 = vld [vmem:[%s2298_s10 + $0x1a0] ss:$16 sps:$4 sm:$0xff]   ;;  %v1874_v20 = vld [vmem:[%s2298_s10 + $0x6c] ss:$16 sps:$4 sm:$0xff]  }
  0x67   : > { %v1808_v41 = vld [vmem:[%s2298_s10 + $0x3a4] ss:$16 sps:$4 sm:$0xff]   ;;  %v1811_v43 = vld [vmem:[%s2298_s10 + $0x3a0] ss:$16 sps:$4 sm:$0xff]   ;;  %v1877_v21 = vld [vmem:[%s2298_s10 + $0x26c] ss:$16 sps:$4 sm:$0xff]  }
  0x68   : > { %1108 = vmatpush1.bf16.msra.mxu0 %v1780_v22  ;;  %v1812_v44 = vld [vmem:[%s2298_s10 + $0x184] ss:$16 sps:$4 sm:$0xff]   ;;  %v1816_v46 = vld [vmem:[%s2298_s10 + $0x180] ss:$16 sps:$4 sm:$0xff]   ;;  %v1872_v22 = vld [vmem:[%s2298_s10 + $0x68] ss:$16 sps:$4 sm:$0xff]  }
  0x69   : > { %1151 = vmatpush1.bf16.msra.mxu1 %v1781_v23  ;;  %1109 = vmatprep.subr.bf16.mxu0 %v1782_v24  ;;  %v1814_v45 = vld [vmem:[%s2298_s10 + $0x384] ss:$16 sps:$4 sm:$0xff]   ;;  %v1817_v47 = vld [vmem:[%s2298_s10 + $0x380] ss:$16 sps:$4 sm:$0xff]   ;;  %v1875_v23 = vld [vmem:[%s2298_s10 + $0x268] ss:$16 sps:$4 sm:$0xff]  }
  0x6a   : > { %1152 = vmatprep.subr.bf16.mxu1 %v1784_v25  ;;  %v1818_v48 = vld [vmem:[%s2298_s10 + $0x164] ss:$16 sps:$4 sm:$0xff]   ;;  %v1822_v52 = vld [vmem:[%s2298_s10 + $0x160] ss:$16 sps:$4 sm:$0xff]   ;;  %v1880_v24 = vld [vmem:[%s2298_s10 + $0x4c] ss:$16 sps:$4 sm:$0xff]  }
  0x6b   : > { %v1844_v49 = vld [vmem:[#allocation3 + $0x4] ss:$16 sps:$4 sm:$0xff]   ;;  %v1823_v53 = vld [vmem:[%s2298_s10 + $0x360] ss:$16 sps:$4 sm:$0xff]   ;;  %v1883_v25 = vld [vmem:[%s2298_s10 + $0x24c] ss:$16 sps:$4 sm:$0xff]  }
  0x6c   : > { %1110 = vmatpush1.bf16.msra.mxu0 %v1786_v26  ;;  %v1820_v50 = vld [vmem:[%s2298_s10 + $0x364] ss:$16 sps:$4 sm:$0xff]   ;;  %1129 = vmatprep.mubr.bf16.mxu0 %v1844_v49  ;;  %v1828_v56 = vld [vmem:[%s2298_s10 + $0x140] ss:$16 sps:$4 sm:$0xff]   ;;  %v1878_v26 = vld [vmem:[%s2298_s10 + $0x48] ss:$16 sps:$4 sm:$0xff]  }
  0x6d   : > { %1153 = vmatpush1.bf16.msra.mxu1 %v1787_v27  ;;  %1111 = vmatprep.subr.bf16.mxu0 %v1788_v28  ;;  %v1824_v54 = vld [vmem:[%s2298_s10 + $0x144] ss:$16 sps:$4 sm:$0xff]   ;;  %v1829_v57 = vld [vmem:[%s2298_s10 + $0x340] ss:$16 sps:$4 sm:$0xff]   ;;  %v1881_v27 = vld [vmem:[%s2298_s10 + $0x248] ss:$16 sps:$4 sm:$0xff]  }
  0x6e   : > { %1154 = vmatprep.subr.bf16.mxu1 %v1790_v29  ;;  %v1826_v55 = vld [vmem:[%s2298_s10 + $0x344] ss:$16 sps:$4 sm:$0xff]   ;;  %v1834_v60 = vld [vmem:[%s2298_s10 + $0x120] ss:$16 sps:$4 sm:$0xff]   ;;  %v1886_v28 = vld [vmem:[%s2298_s10 + $0x2c] ss:$16 sps:$4 sm:$0xff]  }
  0x6f   : > { %v1830_v58 = vld [vmem:[%s2298_s10 + $0x124] ss:$16 sps:$4 sm:$0xff]   ;;  %v1835_v61 = vld [vmem:[%s2298_s10 + $0x320] ss:$16 sps:$4 sm:$0xff]   ;;  %v1889_v29 = vld [vmem:[%s2298_s10 + $0x22c] ss:$16 sps:$4 sm:$0xff]  }
  0x70   : > { %1112 = vmatpush1.bf16.msra.mxu0 %v1792_v30  ;;  %v1832_v59 = vld [vmem:[%s2298_s10 + $0x324] ss:$16 sps:$4 sm:$0xff]   ;;  %v1840_v0 = vld [vmem:[%s2298_s10 + $0x100] ss:$16 sps:$4 sm:$0xff]   ;;  %v1884_v30 = vld [vmem:[%s2298_s10 + $0x28] ss:$16 sps:$4 sm:$0xff]  }
  0x71   : > { %1155 = vmatpush1.bf16.msra.mxu1 %v1793_v31  ;;  %1113 = vmatprep.subr.bf16.mxu0 %v1794_v32  ;;  %v1836_v62 = vld [vmem:[%s2298_s10 + $0x104] ss:$16 sps:$4 sm:$0xff]   ;;  %v1841_v1 = vld [vmem:[%s2298_s10 + $0x300] ss:$16 sps:$4 sm:$0xff]   ;;  %v1887_v31 = vld [vmem:[%s2298_s10 + $0x228] ss:$16 sps:$4 sm:$0xff]  }
  0x72   : > { %1156 = vmatprep.subr.bf16.mxu1 %v1796_v33  ;;  %v1838_v63 = vld [vmem:[%s2298_s10 + $0x304] ss:$16 sps:$4 sm:$0xff]   ;;  %v2370_v4 = vld [vmem:[#allocation3] ss:$16 sps:$4 sm:$0xff]   ;;  %v1892_v32 = vld [vmem:[%s2298_s10 + $0xc] ss:$16 sps:$4 sm:$0xff]  }
  0x73   : > { %v1895_v33 = vld [vmem:[%s2298_s10 + $0x20c] ss:$16 sps:$4 sm:$0xff]   ;;  %s277_s4 = scalar_lea.vmem [#allocation9], %s1513_s29  ;;  %s1661_s22 = sshll.u32 %s2102_s15, 8 }
  0x74   : > { %1114 = vmatpush2.bf16.msra.mxu0 %v1798_v34  ;;  %v1890_v34 = vld [vmem:[%s2298_s10 + $0x8] ss:$16 sps:$4 sm:$0xff]   ;;  %s1371_s11 = sshll.u32 %s277_s4, 4  ;;  %s2448_s28 = scalar_lea.hbm %s2499_s3, %s1661_s22  ;;  %s2443_s11 = int_to_ptr.vmem [resolvable:$true] %s1371_s11 }
  0x75   : > { %1157 = vmatpush2.bf16.msra.mxu1 %v1799_v35  ;;  %1115 = vmatprep.subr.bf16.mxu0 %v1800_v36  ;;  %v1893_v35 = vld [vmem:[%s2298_s10 + $0x208] ss:$16 sps:$4 sm:$0xff]   ;;  %v1898_v36 = vld [vmem:[%s2298_s10 + $0x1ec] ss:$16 sps:$4 sm:$0xff]   ;;  %s1355_s1 = scalar_lea.sflag [#allocation5], %s2295_s7  ;;  %s2026_s5 = scalar_lea.vmem %s2443_s11, 512 }
  0x76   : > { %1158 = vmatprep.subr.bf16.mxu1 %v1802_v37  ;;  %v1901_v37 = vld [vmem:[%s2298_s10 + $0x3ec] ss:$16 sps:$4 sm:$0xff]   ;;  %p2027_p12 = scmp.ne.s32.totalorder %s2443_s11, %s2026_s5  ;;  %p2519_p2 = scmp.ne.s32.totalorder %s2510_s26, 0 }
  0x77   : > { %s2118_s15 = smov [#allocation9]  }
  0x78   : > { %1116 = vmatpush2.bf16.msra.mxu0 %v1804_v38  ;;  %v1896_v38 = vld [vmem:[%s2298_s10 + $0x1e8] ss:$16 sps:$4 sm:$0xff]   ;;  %p2028_p3 = pnand %p2027_p12, %p2519_p2  ;;  %s2030_s19 = sshll.u32 %s2118_s15, 4  ;;  %s2031_s19 = int_to_ptr.vmem [resolvable:$false] %s2030_s19 }
  0x79   : > { %1159 = vmatpush2.bf16.msra.mxu1 %v1805_v39  ;;  %1117 = vmatprep.subr.bf16.mxu0 %v1806_v40  ;;  %v1899_v39 = vld [vmem:[%s2298_s10 + $0x3e8] ss:$16 sps:$4 sm:$0xff]   ;;  %v1904_v40 = vld [vmem:[%s2298_s10 + $0x1cc] ss:$16 sps:$4 sm:$0xff]   ;;  %s2032_s6 = scalar_lea.vmem %s2031_s19, 1024  ;;  %p2033_p0 = scmp.lt.s32.totalorder %s2443_s11, %s2031_s19 }
  0x7a   : > { %1160 = vmatprep.subr.bf16.mxu1 %v1808_v41  ;;  %v1907_v41 = vld [vmem:[%s2298_s10 + $0x3cc] ss:$16 sps:$4 sm:$0xff]   ;;  %p2029_p11 = pneg %p2028_p3  ;;  %p2034_p8 = scmp.lt.s32.totalorder %s2032_s6, %s2026_s5 }
  0x7c   : > { %1118 = vmatpush2.bf16.msra.mxu0 %v1810_v42  ;;  %v1902_v42 = vld [vmem:[%s2298_s10 + $0x1c8] ss:$16 sps:$4 sm:$0xff]   ;;  %p2035_p1 = por %p2034_p8, %p2033_p0 }
  0x7d   : > { %1161 = vmatpush2.bf16.msra.mxu1 %v1811_v43  ;;  %1119 = vmatprep.subr.bf16.mxu0 %v1812_v44  ;;  %v1905_v43 = vld [vmem:[%s2298_s10 + $0x3c8] ss:$16 sps:$4 sm:$0xff]   ;;  %v1910_v44 = vld [vmem:[%s2298_s10 + $0x1ac] ss:$16 sps:$4 sm:$0xff]  }
  0x7e   : > { %1162 = vmatprep.subr.bf16.mxu1 %v1814_v45  ;;  %v1913_v45 = vld [vmem:[%s2298_s10 + $0x3ac] ss:$16 sps:$4 sm:$0xff]   ;;  %p2036_p6 = pnand %p2035_p1, %p2029_p11 }
  0x80   : > { %1120 = vmatpush2.bf16.msra.mxu0 %v1816_v46  ;;  %v1908_v46 = vld [vmem:[%s2298_s10 + $0x1a8] ss:$16 sps:$4 sm:$0xff]  }
  0x81   : > { %1163 = vmatpush2.bf16.msra.mxu1 %v1817_v47  ;;  %1121 = vmatprep.subr.bf16.mxu0 %v1818_v48  ;;  %v1911_v47 = vld [vmem:[%s2298_s10 + $0x3a8] ss:$16 sps:$4 sm:$0xff]   ;;  %v1916_v48 = vld [vmem:[%s2298_s10 + $0x18c] ss:$16 sps:$4 sm:$0xff]  }
  0x82   : > { %1164 = vmatprep.subr.bf16.mxu1 %v1820_v50  ;;  %v1914_v50 = vld [vmem:[%s2298_s10 + $0x188] ss:$16 sps:$4 sm:$0xff]  }
  0x84   : > { %1122 = vmatpush2.bf16.msra.mxu0 %v1822_v52  ;;  %v1922_v52 = vld [vmem:[%s2298_s10 + $0x16c] ss:$16 sps:$4 sm:$0xff]  }
  0x85   : > { %1165 = vmatpush2.bf16.msra.mxu1 %v1823_v53  ;;  %1123 = vmatprep.subr.bf16.mxu0 %v1824_v54  ;;  %v1925_v53 = vld [vmem:[%s2298_s10 + $0x36c] ss:$16 sps:$4 sm:$0xff]   ;;  %v1920_v54 = vld [vmem:[%s2298_s10 + $0x168] ss:$16 sps:$4 sm:$0xff]  }
  0x86   : > { %1166 = vmatprep.subr.bf16.mxu1 %v1826_v55  ;;  %v1923_v55 = vld [vmem:[%s2298_s10 + $0x368] ss:$16 sps:$4 sm:$0xff]  }
  0x88   : > { %1124 = vmatpush2.bf16.msra.mxu0 %v1828_v56  ;;  %v1928_v56 = vld [vmem:[%s2298_s10 + $0x14c] ss:$16 sps:$4 sm:$0xff]  }
  0x89   : > { %1167 = vmatpush2.bf16.msra.mxu1 %v1829_v57  ;;  %1125 = vmatprep.subr.bf16.mxu0 %v1830_v58  ;;  %v1931_v57 = vld [vmem:[%s2298_s10 + $0x34c] ss:$16 sps:$4 sm:$0xff]   ;;  %v1926_v58 = vld [vmem:[%s2298_s10 + $0x148] ss:$16 sps:$4 sm:$0xff]  }
  0x8a   : > { %1168 = vmatprep.subr.bf16.mxu1 %v1832_v59  ;;  %v1929_v59 = vld [vmem:[%s2298_s10 + $0x348] ss:$16 sps:$4 sm:$0xff]  }
  0x8c   : > { %1126 = vmatpush2.bf16.msra.mxu0 %v1834_v60  ;;  %v1934_v60 = vld [vmem:[%s2298_s10 + $0x12c] ss:$16 sps:$4 sm:$0xff]  }
  0x8d   : > { %1169 = vmatpush2.bf16.msra.mxu1 %v1835_v61  ;;  %1127 = vmatprep.subr.bf16.mxu0 %v1836_v62  ;;  %v1937_v61 = vld [vmem:[%s2298_s10 + $0x32c] ss:$16 sps:$4 sm:$0xff]   ;;  %v1932_v62 = vld [vmem:[%s2298_s10 + $0x128] ss:$16 sps:$4 sm:$0xff]  }
  0x8e   : > { %1170 = vmatprep.subr.bf16.mxu1 %v1838_v63  ;;  %v1935_v63 = vld [vmem:[%s2298_s10 + $0x328] ss:$16 sps:$4 sm:$0xff]  }
  0x90   : > { %1128 = vmatpush2.bf16.msra.mxu0 %v1840_v0  ;;  %v1940_v0 = vld [vmem:[%s2298_s10 + $0x10c] ss:$16 sps:$4 sm:$0xff]  }
  0x91   : > { %1171 = vmatpush2.bf16.msra.mxu1 %v1841_v1  ;;  %1183 = vmatprep.subr.bf16.mxu0 %v1850_v2  ;;  %v1943_v1 = vld [vmem:[%s2298_s10 + $0x30c] ss:$16 sps:$4 sm:$0xff]   ;;  %v1938_v2 = vld [vmem:[%s2298_s10 + $0x108] ss:$16 sps:$4 sm:$0xff]  }
  0x92   : > { %1226 = vmatprep.subr.bf16.mxu1 %v1853_v3  ;;  %v1941_v3 = vld [vmem:[%s2298_s10 + $0x308] ss:$16 sps:$4 sm:$0xff]  }
  0x93   : > { %1130 = vmatmul.mubr.bf16.vlgmr.msra.gmra.mxu0 %v2370_v4 }
  0x94   : > { %1173 = vmatmul.mubr.bf16.vlgmr.msra.gmra.mxu1 %v2372_v5  ;;  %1184 = vmatpush1.bf16.msra.mxu0 %v1848_v6  ;;  %v1298_v6 = vlaneseq }
  0x95   : > { %1227 = vmatpush1.bf16.msra.mxu1 %v1851_v7  ;;  %1185 = vmatprep.subr.bf16.mxu0 %v1856_v8 }
  0x96   : > { %1228 = vmatprep.subr.bf16.mxu1 %v1859_v9  ;;  %1215 = vmatprep.mubr.bf16.mxu0 %v1844_v49  ;;  %v1919_v49 = vld [vmem:[%s2298_s10 + $0x38c] ss:$16 sps:$4 sm:$0xff]   ;;  %v1299_v7 = vshrl.u32 %v1298_v6, 7  ;;  %v1296_v9 = vld [vmem:[%s250_s25] sm:$0xf] }
  0x97   : > { %1258 = vmatprep.mubr.bf16.mxu1 %v1847_v51  ;;  %v1917_v51 = vld [vmem:[%s2298_s10 + $0x388] ss:$16 sps:$4 sm:$0xff]  }
  0x98   : > { %1186 = vmatpush1.bf16.msra.mxu0 %v1854_v10  ;;  %v1308_v8 = vsub.s32 2, %v1299_v7 }
  0x99   : > { %1229 = vmatpush1.bf16.msra.mxu1 %v1857_v11  ;;  %1187 = vmatprep.subr.bf16.mxu0 %v1862_v12  ;;  %v1312_v11 = vsub.s32 3, %v1299_v7 }
  0x9a   : > { %1230 = vmatprep.subr.bf16.mxu1 %v1865_v13  ;;  %v1309_v10 = vrot.slane %v1296_v9, %v1308_v8  ;;  %v1300_v13 = vsub.s32 0, %v1299_v7 }
  0x9b   : > { %v1313_v12 = vrot.slane %v1296_v9, %v1312_v11 }
  0x9c   : > { %1188 = vmatpush1.bf16.msra.mxu0 %v1860_v14  ;;  %v1304_v14 = vsub.s32 1, %v1299_v7 }
  0x9d   : > { %1231 = vmatpush1.bf16.msra.mxu1 %v1863_v15  ;;  %1189 = vmatprep.subr.bf16.mxu0 %v1868_v16  ;;  %v1301_v15 = vrot.slane %v1296_v9, %v1300_v13 }
  0x9e   : > { %1232 = vmatprep.subr.bf16.mxu1 %v1871_v17 }
  0xa0   : > { %1190 = vmatpush1.bf16.msra.mxu0 %v1866_v18 }
  0xa1   : > { %1233 = vmatpush1.bf16.msra.mxu1 %v1869_v19  ;;  %1191 = vmatprep.subr.bf16.mxu0 %v1874_v20  ;;  %v1305_v19 = vrot.slane %v1296_v9, %v1304_v14 }
  0xa2   : > { %1234 = vmatprep.subr.bf16.mxu1 %v1877_v21 }
  0xa4   : > { %1192 = vmatpush1.bf16.msra.mxu0 %v1872_v22 }
  0xa5   : > { %1235 = vmatpush1.bf16.msra.mxu1 %v1875_v23  ;;  %1193 = vmatprep.subr.bf16.mxu0 %v1880_v24 }
  0xa6   : > { %1236 = vmatprep.subr.bf16.mxu1 %v1883_v25 }
  0xa8   : > { %1194 = vmatpush1.bf16.msra.mxu0 %v1878_v26 }
  0xa9   : > { %1237 = vmatpush1.bf16.msra.mxu1 %v1881_v27  ;;  %1195 = vmatprep.subr.bf16.mxu0 %v1886_v28 }
  0xaa   : > { %1238 = vmatprep.subr.bf16.mxu1 %v1889_v29 }
  0xac   : > { %1196 = vmatpush1.bf16.msra.mxu0 %v1884_v30 }
  0xad   : > { %1239 = vmatpush1.bf16.msra.mxu1 %v1887_v31  ;;  %1197 = vmatprep.subr.bf16.mxu0 %v1892_v32 }
  0xae   : > { %1240 = vmatprep.subr.bf16.mxu1 %v1895_v33 }
  0xb0   : > { %1198 = vmatpush1.bf16.msra.mxu0 %v1890_v34 }
  0xb1   : > { %1241 = vmatpush1.bf16.msra.mxu1 %v1893_v35  ;;  %1199 = vmatprep.subr.bf16.mxu0 %v1898_v36 }
  0xb2   : > { %1242 = vmatprep.subr.bf16.mxu1 %v1901_v37 }
  0xb4   : > { %1200 = vmatpush2.bf16.msra.mxu0 %v1896_v38 }
  0xb5   : > { %1243 = vmatpush2.bf16.msra.mxu1 %v1899_v39  ;;  %1201 = vmatprep.subr.bf16.mxu0 %v1904_v40 }
  0xb6   : > { %1244 = vmatprep.subr.bf16.mxu1 %v1907_v41 }
  0xb8   : > { %1202 = vmatpush2.bf16.msra.mxu0 %v1902_v42 }
  0xb9   : > { %1245 = vmatpush2.bf16.msra.mxu1 %v1905_v43  ;;  %1203 = vmatprep.subr.bf16.mxu0 %v1910_v44 }
  0xba   : > { %1246 = vmatprep.subr.bf16.mxu1 %v1913_v45 }
  0xbc   : > { %1204 = vmatpush2.bf16.msra.mxu0 %v1908_v46 }
  0xbd   : > { %1247 = vmatpush2.bf16.msra.mxu1 %v1911_v47  ;;  %1205 = vmatprep.subr.bf16.mxu0 %v1916_v48 }
  0xbe   : > { %1248 = vmatprep.subr.bf16.mxu1 %v1919_v49 }
  0xc0   : > { %1206 = vmatpush2.bf16.msra.mxu0 %v1914_v50 }
  0xc1   : > { %1249 = vmatpush2.bf16.msra.mxu1 %v1917_v51  ;;  %1207 = vmatprep.subr.bf16.mxu0 %v1922_v52 }
  0xc2   : > { %1250 = vmatprep.subr.bf16.mxu1 %v1925_v53 }
  0xc4   : > { %1208 = vmatpush2.bf16.msra.mxu0 %v1920_v54 }
  0xc5   : > { %1251 = vmatpush2.bf16.msra.mxu1 %v1923_v55  ;;  %1209 = vmatprep.subr.bf16.mxu0 %v1928_v56 }
  0xc6   : > { %1252 = vmatprep.subr.bf16.mxu1 %v1931_v57 }
  0xc8   : > { %1210 = vmatpush2.bf16.msra.mxu0 %v1926_v58 }
  0xc9   : > { %1253 = vmatpush2.bf16.msra.mxu1 %v1929_v59  ;;  %1211 = vmatprep.subr.bf16.mxu0 %v1934_v60 }
  0xca   : > { %1254 = vmatprep.subr.bf16.mxu1 %v1937_v61 }
  0xcc   : > { %1212 = vmatpush2.bf16.msra.mxu0 %v1932_v62 }
  0xcd   : > { %1255 = vmatpush2.bf16.msra.mxu1 %v1935_v63  ;;  %1213 = vmatprep.subr.bf16.mxu0 %v1940_v0 }
  0xce   : > { %1256 = vmatprep.subr.bf16.mxu1 %v1943_v1 }
  0xd0   : > { %1214 = vmatpush2.bf16.msra.mxu0 %v1938_v2 }
  0xd1   : > { %1257 = vmatpush2.bf16.msra.mxu1 %v1941_v3 }
  0xd3   : > { %1216 = vmatmul.mubr.bf16.vlgmr.msra.gmra.mxu0 %v2370_v4 }
  0xd4   : > { %1259 = vmatmul.mubr.bf16.vlgmr.msra.gmra.mxu1 %v2372_v5 }
 0x153   : > { %v1131_v16 = vpop.f32.mrf.mxu0 }
 0x154   : > { %v1174_v17 = vpop.f32.mrf.mxu1 }
 0x155   : > { %v1175_v18 = vadd.f32 %v1174_v17, %v1131_v16  ;;  %v1133_v4 = vpop.f32.mrf.mxu0 }
 0x156   : > { %v1176_v20 = vpop.f32.mrf.mxu1 }
 0x157   : > { %v1318_v5 = vadd.f32 %v1301_v15, %v1175_v18  ;;  %v1177_v21 = vadd.f32 %v1176_v20, %v1133_v4  ;;  %v1135_v22 = vpop.f32.mrf.mxu0 }
 0x158   : > { %v1178_v23 = vpop.f32.mrf.mxu1 }
 0x159   : > { %v1319_v24 = vadd.f32 %v1305_v19, %v1177_v21  ;;  %v1179_v25 = vadd.f32 %v1178_v23, %v1135_v22  ;;  %v1137_v26 = vpop.f32.mrf.mxu0 }
 0x15a   : > { %v1180_v27 = vpop.f32.mrf.mxu1 }
 0x15b   : > { %v1657_v28 = vpack.c.bf16 %v1319_v24, %v1318_v5  ;;  %v1181_v29 = vadd.f32 %v1180_v27, %v1137_v26  ;;  %v1322_v30 = vadd.f32 %v1301_v15, %v1179_v25 }
 0x15d   : > { %1350 = vst [vmem:[%s277_s4] sm:$0xff] %v1657_v28  ;;  %v1323_v31 = vadd.f32 %v1305_v19, %v1181_v29 }
 0x15f   : > { %v1659_v32 = vpack.c.bf16 %v1323_v31, %v1322_v30 }
 0x161   : > { %1352 = vst [vmem:[%s277_s4 + $0x10] sm:$0xff] %v1659_v32 }
 0x193   : > { %v1217_v33 = vpop.f32.mrf.mxu0 }
 0x194   : > { %v1260_v34 = vpop.f32.mrf.mxu1 }
 0x195   : > { %v1261_v35 = vadd.f32 %v1260_v34, %v1217_v33  ;;  %v1219_v36 = vpop.f32.mrf.mxu0 }
 0x196   : > { %v1262_v37 = vpop.f32.mrf.mxu1 }
 0x197   : > { %v1263_v38 = vadd.f32 %v1262_v37, %v1219_v36  ;;  %v1221_v39 = vpop.f32.mrf.mxu0  ;;  %v1320_v41 = vadd.f32 %v1309_v10, %v1261_v35 }
 0x198   : > { %v1264_v40 = vpop.f32.mrf.mxu1 }
 0x199   : > { %v1321_v42 = vadd.f32 %v1313_v12, %v1263_v38  ;;  %v1265_v43 = vadd.f32 %v1264_v40, %v1221_v39  ;;  %v1223_v44 = vpop.f32.mrf.mxu0 }
 0x19a   : > { %v1266_v45 = vpop.f32.mrf.mxu1 }
 0x19b   : > { %v1658_v46 = vpack.c.bf16 %v1321_v42, %v1320_v41  ;;  %v1267_v47 = vadd.f32 %v1266_v45, %v1223_v44  ;;  %v1324_v48 = vadd.f32 %v1309_v10, %v1265_v43 }
 0x19d   : > { %1351 = vst [vmem:[%s277_s4 + $0x8] sm:$0xff] %v1658_v46  ;;  %v1325_v49 = vadd.f32 %v1313_v12, %v1267_v47 }
 0x19f   : > { %v1660_v50 = vpack.c.bf16 %v1325_v49, %v1324_v48 }
 0x1a1   : > { %1353 = vst [vmem:[%s277_s4 + $0x18] sm:$0xff] %v1660_v50 }
 0x1a2   : > { %2039 = shalt.err (!%p2036_p6)
}
 0x1a3   : > { %s2040_s20 = scalar_lea.hbm %s2448_s28, 512  ;;  %s2044_s10 = scalar_lea.hbm %s2499_s3, 1024 }
 0x1a4   : > { %p2041_p9 = scmp.ne.s32.totalorder %s2448_s28, %s2040_s20  ;;  %p2045_p7 = scmp.lt.s32.totalorder %s2448_s28, %s2499_s3 }
 0x1a5   : > { %p2046_p5 = scmp.lt.s32.totalorder %s2044_s10, %s2040_s20 }
 0x1a6   : > { %p2042_p4 = pnand %p2041_p9, %p2519_p2 }
 0x1a7   : > { %p2047_p10 = por %p2046_p5, %p2045_p7 }
 0x1a8   : > { %p2043_p13 = pneg %p2042_p4 }
 0x1aa   : > { %p2048_p12 = pnand %p2047_p10, %p2043_p13 }
 0x1ac   : > { %2051 = shalt.err (!%p2048_p12)
}
 0x1ad   : > { %s2119_s29 = smov 256   ;;  %s2120_s4 = smov 512  }
 0x1ae   : > { %s2121_s22 = smov 16  }
 0x1af   : > { %1670 = dma.vmem_to_hbm [thread:$0]  (%p2519_p2), %s2443_s11, 512, %s2448_s28, %s1355_s1, %s2119_s29, %s2120_s4, %s2121_s22  }
 0x1b0 PF: > { %s1386_s23 = sand.u32 1, %s2090_s12   ;;  %p2520_p3 = scmp.ne.s32.totalorder %s2511_s27, 0 }
 0x1b1   : > { %p2521_p11 = scmp.ge.s32.totalorder %s2110_s17, 2  ;;  %s1387_s30 = scalar_lea.sflag [#allocation5], %s1386_s23 }
 0x1b3   : > { %p1684_p0 = pnand %p2521_p11, %p2520_p3 }
 0x1b5   : > { %p1685_p8 = pneg %p1684_p0 }
 0x1b7   : > { %2085 = dma.done.wait (%p1685_p8), %s1387_s30, 512  }
 0x1b8   : > { %2087 = vsyncadd (%p1685_p8), %s1387_s30, 4294966784  ;;  %s20_s17 = sadd.s32 1, %s2110_s17   ;;  %s2522_s12 = smov %s2094_s13 }
 0x1b9   : > { %p17_p1 = scmp.ge.s32.totalorder %s20_s17, 4   ;;  %s2523_s13 = smov %s2098_s14 }
 0x1ba   : > { %s2524_s14 = smov %s2193_s24  ;;  %s2525_s15 = smov %s2106_s16 }
 0x1bb   : > { %s2526_s16 = smov %s2528_s18  ;;  %19 = sbr.rel (!%p17_p1) target bundleno = 9 (0x9), region = 102 }
 0x1c0   :  { %1392 = vsyncpa [#allocation4], 1 }
 0x1c1   :  { %1394 = vsyncpa [#allocation4 + $0x1], 1 }
 0x1c2   :  { %1395 = vsyncpa [#allocation7], 1 }
 0x1c3   :  { %1397 = vsyncpa [#allocation7 + $0x1], 1 }
 0x1c4   :  { %1398 = vsyncpa [#allocation5], 1 }
 0x1c5   :  { %1400 = vsyncpa [#allocation5 + $0x1], 1 }

</bundles_post_ra>
